<compile_context>
chip_gen: v7x
topology: tpu7x:2x2x1
jax: 0.10.0
libtpu: 0.0.40
codegen_flags: <defaults>
</compile_context>

<pallas_src>
import jax
import jax.numpy as jnp
from jax.experimental import pallas as pl
from jax.experimental.pallas import tpu as pltpu

NEG_SLOPE = 0.2


def _vmem_capacity_bytes():
    """Physical VMEM per core; conservative (v7x) fallback if unqueryable."""
    try:
        cap = getattr(pltpu.get_tpu_info(), "vmem_capacity_bytes", None)
        if cap:
            return int(cap)
    except Exception:
        pass
    return 64 * 1024 * 1024


def _round_up(x, m):
    return ((x + m - 1) // m) * m


def _choose_tiling(M, K, N, B):
    """Pick pixel-tile width tm, tile count n_m, and the VMEM limit.

    K = 2*Cin rows (bf16 input), N = 2*Cout rows (f32 output), M = H*Wf pixels.
    """
    vmem_cap = _vmem_capacity_bytes()
    # Budget for (2x input tile + 2x output tile + resident weight):
    # ~24 MiB on v7x (64 MiB physical), ~48 MiB on v5e/v6e (128 MiB physical).
    total_budget = (24 * 1024 * 1024 if vmem_cap <= 64 * 1024 * 1024
                    else 48 * 1024 * 1024)
    weight_bytes = 2 * N * K * 2          # bf16 weight, assume double-buffered
    tile_budget = max(1 << 20, total_budget - weight_bytes)

    # Per lane column: double-buffered bf16 input (K rows) + f32 output (N rows).
    per_col = 2 * (K * 2) + 2 * (N * 4)
    tm_max = max(128, (tile_budget // per_col) // 128 * 128)

    # Keep >= 2 parallel grid points when B == 1 so both v7x TCs get work.
    min_tiles = 2 if (B == 1 and M >= 512) else 1

    if M <= tm_max and min_tiles == 1:
        tm, n_m = int(M), 1               # full-dim block (128-divisibility exempt)
    else:
        n_m = max(min_tiles, pl.cdiv(M, tm_max))
        tm = _round_up(pl.cdiv(M, n_m), 128)   # balanced tiles, no sliver tail
        n_m = pl.cdiv(M, tm)

    vmem_limit = int(min(vmem_cap // 2, total_budget + 8 * 1024 * 1024))
    return tm, n_m, vmem_limit


def _conv1x1_lrelu_kernel(x_ref, w_ref, o_ref):
    # x_ref: (1, 2*Cin, TM) bf16   w_ref: (2*Cout, 2*Cin) bf16
    # o_ref: (1, 2*Cout, TM) f32
    y = jnp.dot(w_ref[...], x_ref[0], preferred_element_type=jnp.float32)
    o_ref[0] = jnp.maximum(y, NEG_SLOPE * y).astype(o_ref.dtype)


def _conv1x1_lrelu(x_mat, w_mat):
    """x_mat: (B, K, M) bf16, w_mat: (N, K) bf16  ->  (B, N, M) f32."""
    B, K, M = x_mat.shape
    N, K2 = w_mat.shape
    assert K == K2
    tm, n_m, vmem_limit = _choose_tiling(M, K, N, B)

    cost = pl.CostEstimate(
        flops=2 * B * M * K * N,
        transcendentals=0,
        bytes_accessed=2 * (B * K * M + K * N) + 4 * (B * N * M),
    )

    return pl.pallas_call(
        _conv1x1_lrelu_kernel,
        out_shape=jax.ShapeDtypeStruct((B, N, M), jnp.float32),
        grid_spec=pltpu.PrefetchScalarGridSpec(
            num_scalar_prefetch=0,
            grid=(B, n_m),
            in_specs=[
                pl.BlockSpec((1, K, tm), lambda b, m: (b, 0, m)),
                pl.BlockSpec((N, K), lambda b, m: (0, 0)),  # weight stays resident
            ],
            out_specs=pl.BlockSpec((1, N, tm), lambda b, m: (b, 0, m)),
        ),
        compiler_params=pltpu.CompilerParams(
            dimension_semantics=("parallel", "parallel"),
            vmem_limit_bytes=vmem_limit,
        ),
        cost_estimate=cost,
    )(x_mat, w_mat)


def fourier_unit_forward(x, weight, fft_norm="ortho"):
    """x: (B, C, H, W) float32 (NCHW, as in PyTorch).
    weight: (2*Cout, 2*Cin) -- squeezed Conv2d 1x1 weight, groups=1, no bias."""
    B, C, H, W = x.shape
    two_cout, two_cin = weight.shape
    assert two_cin == 2 * C
    Cout = two_cout // 2

    # rfftn over spatial dims.
    ffted = jnp.fft.rfftn(x, axes=(-2, -1), norm=fft_norm)   # (B, C, H, Wf) complex
    Wf = ffted.shape[-1]
    M = H * Wf

    # (B, C, 2, H, Wf) -> (B, 2C, H*Wf): real/imag interleaved per channel,
    # matching PyTorch's stack(dim=-1).permute(0,1,4,2,3).view layout. Pure
    # reshape after the stack; channels on sublanes, pixels on lanes.
    stacked = jnp.stack([jnp.real(ffted), jnp.imag(ffted)], axis=2)
    x_mat = stacked.reshape(B, 2 * C, M).astype(jnp.bfloat16)   # bf16 feed
    w_mat = weight.astype(jnp.bfloat16)                         # (2*Cout, 2*Cin)

    y = _conv1x1_lrelu(x_mat, w_mat)                            # (B, 2*Cout, M) f32

    # (B, Cout, 2, H, Wf) -> complex -> irfftn back to (H, W).
    y = y.reshape(B, Cout, 2, H, Wf)
    y_c = jax.lax.complex(y[:, :, 0], y[:, :, 1])
    out = jnp.fft.irfftn(y_c, s=(H, W), axes=(-2, -1), norm=fft_norm)
    return out.astype(jnp.float32)


def _reference_forward(x, weight, fft_norm="ortho", cast_bf16=True):
    """Pure-JAX reference mirroring the PyTorch module.

    cast_bf16=True mirrors the kernel's dtype strategy (bf16 conv inputs, f32
    accumulation) for a tight comparison; cast_bf16=False is the exact-f32
    semantics of the original module."""
    B, C, H, W = x.shape
    Cout = weight.shape[0] // 2
    ffted = jnp.fft.rfftn(x, axes=(-2, -1), norm=fft_norm)
    Wf = ffted.shape[-1]
    st = jnp.stack([jnp.real(ffted), jnp.imag(ffted)], axis=2).reshape(B, 2 * C, H, Wf)
    if cast_bf16:
        st = st.astype(jnp.bfloat16)
        weight = weight.astype(jnp.bfloat16)
    conv = jnp.einsum("oi,bihw->bohw", weight, st,
                      preferred_element_type=jnp.float32)
    conv = jnp.maximum(conv, NEG_SLOPE * conv)
    conv = conv.reshape(B, Cout, 2, H, Wf)
    y_c = jax.lax.complex(conv[:, :, 0], conv[:, :, 1])
    return jnp.fft.irfftn(y_c, s=(H, W), axes=(-2, -1), norm=fft_norm)


if __name__ == "__main__":
    key = jax.random.PRNGKey(0)
    kx, kw, kx2 = jax.random.split(key, 3)

    # Small config consistent with the module: in_channels = out_channels = 4.
    B, C, H, W = 2, 4, 16, 16
    x = jax.random.normal(kx, (B, C, H, W), dtype=jnp.float32)

    # Conv2d(2*C, 2*C, kernel_size=1, bias=False) weight (kaiming-uniform-ish),
    # squeezed to (2*Cout, 2*Cin).
    fan_in = 2 * C
    bound = 1.0 / jnp.sqrt(fan_in)
    weight = jax.random.uniform(kw, (2 * C, 2 * C), dtype=jnp.float32,
                                minval=-bound, maxval=bound)

    out = jax.block_until_ready(fourier_unit_forward(x, weight))
    assert out.shape == (B, C, H, W)
    # Tight check vs bf16-matched reference (same dtype strategy as kernel).
    ref_bf = _reference_forward(x, weight, cast_bf16=True)
    assert jnp.allclose(out, ref_bf, atol=1e-3, rtol=1e-3)
    # Loose semantics check vs exact-f32 reference (bf16 input rounding only).
    ref_f32 = _reference_forward(x, weight, cast_bf16=False)
    assert jnp.allclose(out, ref_f32, atol=5e-2, rtol=5e-2)

    # Larger spatial size so M = H*(W//2+1) = 2112 with B=1: exercises the
    # balanced multi-tile path (>=2 parallel tiles for megacore).
    B2, H2, W2 = 1, 64, 64
    x2 = jax.random.normal(kx2, (B2, C, H2, W2), dtype=jnp.float32)
    out2 = jax.block_until_ready(fourier_unit_forward(x2, weight))
    assert out2.shape == (B2, C, H2, W2)
    ref2_bf = _reference_forward(x2, weight, cast_bf16=True)
    assert jnp.allclose(out2, ref2_bf, atol=1e-3, rtol=1e-3)
    ref2_f32 = _reference_forward(x2, weight, cast_bf16=False)
    assert jnp.allclose(out2, ref2_f32, atol=5e-2, rtol=5e-2)

    print("KERNEL_OK")
</pallas_src>

<mosaic_0001>
module attributes {stable_mosaic.version = 11 : i64} {
  func.func @_conv1x1_lrelu_kernel(%arg0: i32, %arg1: i32, %arg2: memref<1x8x144xbf16, #tpu.memory_space<vmem>>, %arg3: memref<8x8xbf16, #tpu.memory_space<vmem>>, %arg4: memref<1x8x144xf32, #tpu.memory_space<vmem>>) attributes {dimension_semantics = [#tpu.dimension_semantics<parallel>, #tpu.dimension_semantics<parallel>], iteration_bounds = array<i64: 2, 1>, scalar_prefetch = 0 : i64, scratch_operands = 0 : i64, tpu.core_type = #tpu.core_type<tc>, window_params = [{transform_indices = @transform_0, window_bounds = array<i64: 1, 8, 144>}, {pipeline_mode = #tpu.pipeline_mode<synchronous>, transform_indices = @transform_1, window_bounds = array<i64: 8, 8>}, {transform_indices = @transform_2, window_bounds = array<i64: 1, 8, 144>}]} {
    %c0 = arith.constant 0 : index
    %c0_0 = arith.constant 0 : index
    %0 = vector.load %arg3[%c0, %c0_0] : memref<8x8xbf16, #tpu.memory_space<vmem>>, vector<8x8xbf16>
    %c0_1 = arith.constant 0 : index
    %c0_2 = arith.constant 0 : index
    %c0_3 = arith.constant 0 : index
    %1 = vector.load %arg2[%c0_1, %c0_2, %c0_3] : memref<1x8x144xbf16, #tpu.memory_space<vmem>>, vector<1x8x144xbf16>
    %2 = vector.shape_cast %1 : vector<1x8x144xbf16> to vector<8x144xbf16>
    %cst = arith.constant dense<0.000000e+00> : vector<8x144xf32>
    %3 = tpu.matmul %0, %2, %cst {dimension_numbers = #tpu.dot_dimension_numbers<[1], [0], [0], [1], [0, 0, 1, 1], [], []>} : vector<8x8xbf16>, vector<8x144xbf16>, vector<8x144xf32> -> vector<8x144xf32>
    %cst_4 = arith.constant 2.000000e-01 : f32
    %4 = vector.broadcast %cst_4 : f32 to vector<8x144xf32>
    %5 = arith.mulf %4, %3 : vector<8x144xf32>
    %6 = arith.maximumf %3, %5 : vector<8x144xf32>
    %c0_5 = arith.constant 0 : index
    %c0_6 = arith.constant 0 : index
    %c0_7 = arith.constant 0 : index
    %7 = vector.load %arg4[%c0_5, %c0_6, %c0_7] : memref<1x8x144xf32, #tpu.memory_space<vmem>>, vector<1x8x144xf32>
    %8 = vector.shape_cast %7 : vector<1x8x144xf32> to vector<8x144xf32>
    %9 = vector.shape_cast %6 : vector<8x144xf32> to vector<1x8x144xf32>
    tpu.vector_store %arg4[%c0_5, %c0_6, %c0_7], %9 {strides = array<i32>} : memref<1x8x144xf32, #tpu.memory_space<vmem>>, vector<1x8x144xf32>,
    return
  }
  func.func @transform_0(%arg0: i32, %arg1: i32) -> (i32, i32, i32) {
    %c0_i32 = arith.constant 0 : i32
    %c0_i32_0 = arith.constant 0 : i32
    return %arg0, %c0_i32, %arg1 : i32, i32, i32
  }
  func.func @transform_1(%arg0: i32, %arg1: i32) -> (i32, i32) {
    %c0_i32 = arith.constant 0 : i32
    %c0_i32_0 = arith.constant 0 : i32
    %c0_i32_1 = arith.constant 0 : i32
    return %c0_i32, %c0_i32_0 : i32, i32
  }
  func.func @transform_2(%arg0: i32, %arg1: i32) -> (i32, i32, i32) {
    %c0_i32 = arith.constant 0 : i32
    %c0_i32_0 = arith.constant 0 : i32
    return %arg0, %c0_i32, %arg1 : i32, i32, i32
  }
}

</mosaic_0001>

<bundles_post_ra>
// kernel: tpu_custom_call.1
= control target key start
LH: loop header
LB: loop body
LE: loop exit
PB: predicated region body
PF: predicated region fallthrough
CT: control target
= control target key end

     0   :  { %7 = vsyncpa [#allocation3], 0  ;;  %s852_s0 = inlined_call_operand.hbm [shape: bf16[2,8,144], index: 0, kind: input, shape index: {}]   ;;  %s853_s1 = inlined_call_operand.hbm [shape: bf16[8,8], index: 1, kind: input, shape index: {}]   ;;  %s854_s2 = inlined_call_operand.hbm [shape: f32[2,8,144], index: 2, kind: output, shape index: {}]  }
   0x1   :  { %9 = vsyncpa [#allocation3 + $0x1], 0 }
   0x2   :  { %10 = vsyncpa [#allocation6], 0 }
   0x3   :  { %11 = vsyncpa [#allocation4], 0 }
   0x4   :  { %13 = vsyncpa [#allocation4 + $0x1], 0  ;;  %s635_s9 = smov 0   ;;  %s637_s10 = smov 0  }
   0x5   :  { %s639_s11 = smov 0   ;;  %s641_s12 = smov 0  }
   0x6   :  { %s643_s13 = smov 0   ;;  %s645_s14 = smov 0  }
   0x7 LB: > { %s371_s15 = sadd.s32 4294967295, %s614_s14   ;;  %s372_s16 = sadd.s32 4294967294, %s614_s14   ;;  %s614_s14 = sphi %s645_s14, %s19_s14   ;;  %s610_s13 = sphi %s643_s13, %s879_s13   ;;  %s606_s12 = sphi %s641_s12, %s878_s12   ;;  %s602_s11 = sphi %s639_s11, %s877_s11   ;;  %s598_s10 = sphi %s637_s10, %s876_s10   ;;  %s594_s9 = sphi %s635_s9, %s875_s9  }
   0x8   : > { %p53_p0 = scmp.ne.s32.totalorder %s598_s10, %s594_s9  ;;  %p669_p1 = scmp.eq.s32.totalorder %s371_s15, 0 }
   0x9   : > { %p673_p2 = scmp.eq.s32.totalorder %s371_s15, 1  ;;  %p106_p3 = scmp.eq.s32.totalorder %s372_s16, 1 }
   0xa   : > { %s859_s17 = scalar_select %p669_p1, 1, 0 }
   0xb   : > { %s860_s18 = scalar_select %p673_p2, 1, 0 }
   0xc   : > { %p679_p4 = por %p669_p1, %p53_p0  ;;  %p373_p5 = scmp.ge.s32.totalorder %s614_s14, 1 }
   0xd   : > { %p684_p6 = por %p106_p3, %p53_p0  ;;  %p113_p7 = scmp.lt.s32.totalorder %s614_s14, 3 }
   0xe   : > { %s861_s19 = scalar_select %p679_p4, 1, 0 }
   0xf   : > { %s862_s20 = scalar_select %p684_p6, 1, 0 }
  0x10   : > { %p689_p8 = pnand %p373_p5, %p113_p7  ;;  %s616_s22 = smov [#allocation5]  }
  0x11   : > { %s126_s23 = sshll.u32 %s616_s22, 4  ;;  %s31_s25 = sadd.s32 1, %s610_s13  ;;  %s127_s23 = int_to_ptr.vmem [resolvable:$true] %s126_s23 }
  0x12   : > { %s863_s21 = scalar_select %p689_p8, 1, 0 }
  0x13   : > { %p402_p10 = pneg %p689_p8  ;;  %s40_s26 = sadd.s32 1, %s602_s11 }
  0x14   : > { %p704_p12 = scmp.ge.s32.totalorder %s31_s25, 2  ;;  %s470_s30 = scalar_lea.hbm %s853_s1, 64 }
  0x15   : > { %p698_p11 = pnand %p402_p10, %p669_p1  ;;  %p471_p13 = scmp.ne.s32.totalorder %s853_s1, %s470_s30 }
  0x16   : > { %s865_s27 = scalar_select %p704_p12, 1, 0 }
  0x17   : > { %p472_p0 = pneg %p698_p11  ;;  %p477_p7 = scmp.lt.u32.totalorder %s470_s30, %s853_s1 }
  0x19   : > { %p473_p3 = pnand %p472_p0, %p471_p13 }
  0x1b   : > { %p474_p5 = pneg %p473_p3 }
  0x1d   : > { %p479_p10 = pnand %p477_p7, %p474_p5 }
  0x1f   : > { %482 = shalt.err (!%p479_p10)
}
  0x20   : > { %s483_s7 = scalar_lea.vmem %s127_s23, 64  ;;  %p491_p4 = scmp.lt.s32.totalorder %s127_s23, %s127_s23 }
  0x21   : > { %p484_p9 = scmp.ne.s32.totalorder %s127_s23, %s483_s7  ;;  %p492_p8 = scmp.lt.s32.totalorder %s483_s7, %s483_s7 }
  0x23   : > { %p486_p6 = pnand %p484_p9, %p472_p0  ;;  %p493_p2 = por %p492_p8, %p491_p4 }
  0x25   : > { %p487_p1 = pneg %p486_p6 }
  0x27   : > { %p494_p12 = pnand %p493_p2, %p487_p1 }
  0x29   : > { %497 = shalt.err (!%p494_p12)
}
  0x2a   : > { %405 = dma.hbm_to_vmem [thread:$0]  (!%p698_p11), %s853_s1, 64, %s127_s23, [#allocation6]  }
  0x2b   : > { %p866_p4 = scmp.ne.s32.totalorder %s865_s27, 0  ;;  %p47_p1 = scmp.ne.s32.totalorder %s602_s11, %s598_s10 }
  0x2c   : > { %p48_p2 = scmp.eq.s32.totalorder %s614_s14, 0  ;;  %p415_p6 = scmp.lt.s32.totalorder %s614_s14, 2 }
  0x2d   : > { %s881_s25 = smov (%p866_p4, %s31_s25), 0  ;;  %p867_p12 = scmp.ne.s32.totalorder %s860_s18, 0 }
  0x2e   : > { %s35_s16 = ssub.s32 %s610_s13, %s881_s25  ;;  %p49_p9 = por %p48_p2, %p47_p1 }
  0x2f   : > { %p38_p8 = scmp.eq.s32.totalorder %s35_s16, 0  ;;  %p736_p13 = por %p867_p12, %p47_p1 }
  0x30   : > { %s137_s24 = sand.u32 1, %s602_s11   ;;  %s392_s27 = sshll.u32 %s610_s13, 7 }
  0x31   : > { %s744_s28 = scalar_select %p38_p8, %s602_s11, %s40_s26  }
  0x32   : > { %s376_s23 = sshll.u32 %s137_s24, 3  ;;  %s750_s3 = scalar_lea.hbm %s852_s0, %s392_s27 }
  0x33   : > { %s141_s18 = scalar_lea.vmem [#allocation2], %s376_s23  ;;  %p754_p11 = pnand %p415_p6, %p49_p9 }
  0x34   : > { %s151_s4 = sshll.u32 %s141_s18, 4  ;;  %s138_s26 = scalar_lea.sflag [#allocation3], %s137_s24  ;;  %s752_s4 = int_to_ptr.vmem [resolvable:$true] %s151_s4 }
  0x35   : > { %s498_s6 = scalar_lea.hbm %s750_s3, 128  ;;  %p500_p3 = pneg %p754_p11 }
  0x36   : > { %p499_p0 = scmp.ne.s32.totalorder %s750_s3, %s498_s6  ;;  %s503_s15 = scalar_lea.hbm %s852_s0, 256 }
  0x37   : > { %p504_p10 = scmp.lt.u32.totalorder %s750_s3, %s852_s0  ;;  %p505_p4 = scmp.lt.u32.totalorder %s503_s15, %s498_s6 }
  0x38   : > { %p501_p5 = pnand %p500_p3, %p499_p0  ;;  %p507_p2 = scmp.lt.u32.totalorder %s498_s6, %s750_s3 }
  0x39   : > { %p506_p1 = por %p505_p4, %p504_p10 }
  0x3a   : > { %p502_p7 = pneg %p501_p5 }
  0x3b   : > { %p508_p6 = por %p507_p2, %p506_p1 }
  0x3d   : > { %p509_p8 = pnand %p508_p6, %p502_p7 }
  0x3f   : > { %512 = shalt.err (!%p509_p8)
}
  0x40   : > { %s513_s24 = scalar_lea.vmem %s752_s4, 128  ;;  %s617_s27 = smov [#allocation2]  }
  0x41   : > { %p514_p9 = scmp.ne.s32.totalorder %s752_s4, %s513_s24  ;;  %s518_s29 = sshll.u32 %s617_s27, 4  ;;  %s519_s29 = int_to_ptr.vmem [resolvable:$false] %s518_s29 }
  0x42   : > { %s520_s30 = scalar_lea.vmem %s519_s29, 256  ;;  %p521_p5 = scmp.lt.s32.totalorder %s752_s4, %s519_s29 }
  0x43   : > { %p516_p12 = pnand %p514_p9, %p500_p3  ;;  %p522_p10 = scmp.lt.s32.totalorder %s520_s30, %s513_s24 }
  0x45   : > { %p517_p0 = pneg %p516_p12  ;;  %p523_p4 = por %p522_p10, %p521_p5 }
  0x47   : > { %p524_p1 = pnand %p523_p4, %p517_p0 }
  0x49   : > { %527 = shalt.err (!%p524_p1)
}
  0x4a   : > { %409 = dma.hbm_to_vmem [thread:$0]  (!%p754_p11), %s750_s3, 128, %s752_s4, %s138_s26  }
  0x4b   : > { %p870_p7 = scmp.ne.s32.totalorder %s863_s21, 0 }
  0x4c   : > { %s786_s18 = sand.u32 (!%p870_p7), 1, %s598_s10   ;;  %p871_p3 = scmp.ne.s32.totalorder (!%p870_p7), %s861_s19, 0 }
  0x4d   : > { %160 = sbr.rel (%p870_p7) target bundleno = 326 (0x146), region = 28  ;;  %s380_s6 = sshll.u32 (!%p870_p7), %s786_s18, 3 }
  0x4e   : > { %s163_s7 = scalar_lea.sflag (!%p870_p7), [#allocation3], %s786_s18  ;;  %s166_s8 = scalar_lea.vmem (!%p870_p7), [#allocation2], %s380_s6 }
  0x54   : > { %581 = dma.done.wait (%p871_p3), %s163_s7, 128  }
  0x55   : > { %583 = vsyncadd (%p871_p3), %s163_s7, 4294967168  ;;  %p872_p2 = scmp.ne.s32.totalorder %s859_s17, 0 }
  0x57   : > { %585 = dma.done.wait (%p872_p2), [#allocation6], 64  }
  0x58   : > { %587 = vsyncadd (%p872_p2), [#allocation6], 4294967232  ;;  %v618_v0 = vmov 0   ;;  %v195_v1 = vld [vmem:[%s166_s8] sm:$0xff]  ;;  %vm205_vm0 = vcmask 1043456   ;;  %vm201_vm1 = vcmask 64512  }
  0x59   : > { %244 = vmatprep.mubr.bf16.mxu0 %v618_v0  ;;  %v384_v2 = vcombine.high %v195_v1, %v195_v1  ;;  %v383_v3 = vcombine.low %v195_v1, %v195_v1  ;;  %v194_v5 = vld [vmem:[#allocation5] sm:$0xf]  ;;  %s382_s19 = sshll.u32 %s786_s18, 4  ;;  %s393_s17 = sshll.u32 %s606_s12, 8  ;;  %vm258_vm2 = vcmask 130048  }
  0x5a   : > { %s190_s21 = scalar_lea.vmem [#allocation7], %s382_s19  ;;  %s803_s26 = scalar_lea.hbm %s854_s2, %s393_s17 }
  0x5b   : > { %385 = vmatprep.subr.msk.bf16.mxu0 %vm205_vm0, %v384_v2  ;;  %v207_v4 = vsel %vm205_vm0, %v383_v3, 0  ;;  %s277_s3 = sshll.u32 %s190_s21, 4  ;;  %s261_s12 = scalar_lea.sflag [#allocation4], %s786_s18  ;;  %s805_s3 = int_to_ptr.vmem [resolvable:$true] %s277_s3 }
  0x5c   : > { %213 = vmatpush1.bf16.msra.mxu0 %v207_v4  ;;  %s528_s15 = scalar_lea.vmem %s805_s3, 256  ;;  %s619_s16 = smov [#allocation7]  }
  0x5d   : > { %p529_p11 = scmp.ne.s32.totalorder %s805_s3, %s528_s15  ;;  %s532_s23 = sshll.u32 %s619_s16, 4  ;;  %s533_s23 = int_to_ptr.vmem [resolvable:$false] %s532_s23 }
  0x5e   : > { %s534_s24 = scalar_lea.vmem %s533_s23, 512  ;;  %p535_p9 = scmp.lt.s32.totalorder %s805_s3, %s533_s23 }
  0x5f   : > { %386 = vmatmul.mubr.msk.bf16.vlgmr.msra.gmra.mrb[0].mxu0 %vm201_vm1, %v194_v5  ;;  %p530_p6 = pnand %p529_p11, %p736_p13  ;;  %p536_p12 = scmp.lt.s32.totalorder %s534_s24, %s528_s15 }
  0x61   : > { %p531_p8 = pneg %p530_p6  ;;  %p537_p0 = por %p536_p12, %p535_p9 }
  0x63   : > { %p538_p5 = pnand %p537_p0, %p531_p8 }
 0x132   : > { %v246_v6 = vpop.f32.mrb[0].mxu0 }
 0x133   : > { %v253_v7 = vmul.f32 0.2, %v246_v6  ;;  %v248_v8 = vpop.f32.mrb[1].mxu0 }
 0x134   : > { %v254_v9 = vmul.f32 0.2, %v248_v8  ;;  %v250_v10 = vpop.f32.mrb[2].mxu0 }
 0x135   : > { %v255_v11 = vmax.f32 %v246_v6, %v253_v7  ;;  %v251_v12 = vpop.f32.mrb[3].mxu0 }
 0x136   : > { %v256_v13 = vmax.f32 %v248_v8, %v254_v9 }
 0x137   : > { %257 = vst [vmem:[%s190_s21] sm:$0xff] %v255_v11 }
 0x138   : > { %259 = vst.msk [vmem:[%s190_s21 + $0x8] sm:$0xff] %vm258_vm2, %v256_v13 }
 0x139   : > { %541 = shalt.err (!%p538_p5)
}
 0x13a   : > { %s542_s27 = scalar_lea.hbm %s803_s26, 256  ;;  %s546_s18 = scalar_lea.hbm %s854_s2, 512 }
 0x13b   : > { %p543_p10 = scmp.ne.s32.totalorder %s803_s26, %s542_s27  ;;  %p547_p7 = scmp.lt.u32.totalorder %s803_s26, %s854_s2 }
 0x13c   : > { %p548_p3 = scmp.lt.u32.totalorder %s546_s18, %s542_s27  ;;  %p550_p11 = scmp.lt.u32.totalorder %s542_s27, %s803_s26 }
 0x13d   : > { %p544_p4 = pnand %p543_p10, %p736_p13 }
 0x13e   : > { %p549_p2 = por %p548_p3, %p547_p7 }
 0x13f   : > { %p545_p1 = pneg %p544_p4 }
 0x140   : > { %p551_p6 = por %p550_p11, %p549_p2 }
 0x142   : > { %p552_p8 = pnand %p551_p6, %p545_p1 }
 0x144   : > { %555 = shalt.err (!%p552_p8)
}
 0x145   : > { %400 = dma.vmem_to_hbm [thread:$0]  (%p736_p13), %s805_s3, 256, %s803_s26, %s261_s12  }
 0x146 PF: > { %s289_s8 = sand.u32 1, %s594_s9   ;;  %p873_p9 = scmp.ne.s32.totalorder %s862_s20, 0 }
 0x147   : > { %p874_p12 = scmp.ge.s32.totalorder %s614_s14, 2  ;;  %s290_s19 = scalar_lea.sflag [#allocation4], %s289_s8 }
 0x149   : > { %p411_p0 = pnand %p874_p12, %p873_p9 }
 0x14b   : > { %589 = dma.done.wait (!%p411_p0), %s290_s19, 256  }
 0x14c   : > { %591 = vsyncadd (!%p411_p0), %s290_s19, 4294967040  ;;  %s19_s14 = sadd.s32 1, %s614_s14   ;;  %s875_s9 = smov %s598_s10 }
 0x14d   : > { %p16_p5 = scmp.ge.s32.totalorder %s19_s14, 4   ;;  %s876_s10 = smov %s602_s11 }
 0x14e   : > { %s877_s11 = smov %s744_s28  ;;  %s878_s12 = smov %s610_s13 }
 0x14f   : > { %s879_s13 = smov %s881_s25  ;;  %18 = sbr.rel (!%p16_p5) target bundleno = 7 (0x7), region = 77 }
 0x156   :  { %295 = vsyncpa [#allocation3], 1 }
 0x157   :  { %297 = vsyncpa [#allocation3 + $0x1], 1 }
 0x158   :  { %298 = vsyncpa [#allocation6], 1 }
 0x159   :  { %299 = vsyncpa [#allocation4], 1 }
 0x15a   :  { %301 = vsyncpa [#allocation4 + $0x1], 1 }

</bundles_post_ra>
